<compile_context>
chip_gen: v6e
topology: v6e:2x2x1
jax: 0.10.0
libtpu: 0.0.40
codegen_flags: <defaults>
</compile_context>

<pallas_src>
import jax
import jax.numpy as jnp
from jax.experimental import pallas as pl
from jax.experimental.pallas import tpu as pltpu

# Keep the pure-JAX reference (and any wrapper matmuls) at full f32 precision so the
# correctness gate compares exact-vs-exact.
jax.config.update("jax_default_matmul_precision", "highest")

DIM = 3          # point dimension (GAP default dim=3)
F = 16           # per-head feature width (GAP default F=16)
M = 4            # number of heads (all heads share ONE SingleGAP -> identical outputs)
KNN = 10         # KNN_size default
B = 2            # batch / number of points

FM = F * M       # 64   — final per-(point, neighbour) feature width
C = KNN * FM     # 640  — lane-dense graph width (5 * 128)
WIDTH = C + 128  # 768  — [graph cols | KNN score cols | zero pad], 6 * 128 lanes


# ---------------------------------------------------------------------------
# Fused kernel: one linear map -> softmax(dim=0) -> attention.
# ---------------------------------------------------------------------------
def _gap_fused_kernel(xk_ref, xn_ref, wk_ref, wn_ref, b_ref, attn_ref, graph_ref):
    # xk_ref : (B, DIM*KNN)  neighbours, flat (free bitcast of native (B, DIM, KNN))
    # xn_ref : (B, DIM)      centre points
    # wk_ref : (DIM*KNN, WIDTH) precomputed [graph | score] weights
    # wn_ref : (DIM, WIDTH)     centre-point contribution (score columns only)
    # b_ref  : (1, WIDTH)       precomputed bias
    full = (
        jnp.dot(xk_ref[...], wk_ref[...],
                precision=jax.lax.Precision.HIGHEST,
                preferred_element_type=jnp.float32)
        + jnp.dot(xn_ref[...], wn_ref[...],
                  precision=jax.lax.Precision.HIGHEST,
                  preferred_element_type=jnp.float32)
        + b_ref[...]
    )                                                   # (B, WIDTH)

    # Graph features already in the final (B, KNN*F*M) layout -> lane-dense store.
    graph = full[:, :C]                                 # (B, 640)
    graph_ref[...] = graph

    # Pre-softmax scores:  mlp1(mlpF(xknn_j)) + mlp1(mlpF(xn))  (linear, folded into W).
    pre = full[:, C:C + KNN]                            # (B, KNN)

    # Legacy torch F.softmax(x) on a 3-D tensor defaults to dim=0 (batch axis).
    mx = jnp.max(pre, axis=0, keepdims=True)
    ex = jnp.exp(pre - mx)
    attw = ex / jnp.sum(ex, axis=0, keepdims=True)      # exact division (no approx recip)

    # Attention: 10-term weighted sum over neighbours, produced directly in the
    # repeated-heads (B, F*M) layout.
    acc = attw[:, 0:1] * graph[:, 0:FM]
    for k in range(1, KNN):
        acc = acc + attw[:, k:k + 1] * graph[:, k * FM:(k + 1) * FM]
    attn_ref[...] = acc                                 # (B, FM)


# ---------------------------------------------------------------------------
# Parameters (deterministic, synthetic) and one-time kernel-weight preparation.
# ---------------------------------------------------------------------------
def init_params(key):
    k1, k2, k3, k4 = jax.random.split(key, 4)
    wF = 0.3 * jax.random.normal(k1, (F, DIM), jnp.float32)   # Conv1d(dim, F, 1).weight[:, :, 0]
    bF = 0.1 * jax.random.normal(k2, (F,), jnp.float32)       # Conv1d(dim, F, 1).bias
    w1 = 0.3 * jax.random.normal(k3, (1, F), jnp.float32)     # Conv1d(F, 1, 1).weight[:, :, 0]
    b1 = 0.1 * jax.random.normal(k4, (1,), jnp.float32)       # Conv1d(F, 1, 1).bias
    return wF, bF, w1, b1


def prepare_gap_params(params):
    """One-time (hoisted) expansion of the tiny weights into the fused kernel matrices.

    Column layout of Wk / Wn / bias (width WIDTH = 768):
      [0, 640)        graph features, already in torch's raw (B,F,K)->(B,K,F) view with
                      the heads-innermost repeat to F*M baked in.
      [640, 650)      pre-softmax scores for the KNN neighbours (folded mlp1∘mlpF).
      [650, 768)      zero padding (keeps the dot output 6*128 lanes).
    """
    wF, bF, w1, b1 = params

    # graph column -> (feature, neighbour) indices realizing the raw reshape + head repeat
    cc = jnp.arange(C)
    k = cc // FM
    f = (cc % FM) // M
    n = k * F + f
    f_idx = n // KNN                       # which mlpF feature feeds this column
    k_idx = n % KNN                        # which neighbour feeds this column

    rows = jnp.arange(DIM * KNN)           # x_flat[b, d*KNN + j] = xknn[b, d, j]
    d_row = rows // KNN
    j_row = rows % KNN

    wk_graph = (wF[f_idx[None, :], d_row[:, None]]
                * (j_row[:, None] == k_idx[None, :]).astype(jnp.float32))   # (30, 640)
    bias_graph = bF[f_idx]                                                  # (640,)

    # mlp1(mlpF(x)) has no nonlinearity in between -> exactly weff . x + beff
    weff = (w1 @ wF).reshape(DIM)                                           # (3,)
    beff = (w1 @ bF + b1).reshape(())                                       # scalar
    jj = jnp.arange(KNN)
    wk_score = weff[d_row][:, None] * (j_row[:, None] == jj[None, :]).astype(jnp.float32)

    wk = jnp.zeros((DIM * KNN, WIDTH), jnp.float32)
    wk = wk.at[:, :C].set(wk_graph).at[:, C:C + KNN].set(wk_score)

    wn = jnp.zeros((DIM, WIDTH), jnp.float32)
    wn = wn.at[:, C:C + KNN].set(jnp.broadcast_to(weff[:, None], (DIM, KNN)))

    bias = jnp.zeros((1, WIDTH), jnp.float32)
    bias = bias.at[0, :C].set(bias_graph).at[0, C:C + KNN].set(2.0 * beff)
    return wk, wn, bias


def gap_forward(xknn, xn, prepared):
    """xknn: (B, dim, KNN) neighbours, xn: (B, dim) centre points."""
    wk, wn, bias = prepared
    nb = xknn.shape[0]

    # Free bitcast: native (B, dim, KNN) contiguous -> (B, dim*KNN). No transpose, no gather.
    x_flat = xknn.reshape(nb, DIM * KNN).astype(jnp.float32)

    attn, graph_flat = pl.pallas_call(
        _gap_fused_kernel,
        # No grid: single invocation, whole arrays resident in VMEM (total < 0.2 MiB).
        in_specs=[
            pl.BlockSpec(memory_space=pltpu.MemorySpace.VMEM),   # x_flat  (B, 30)
            pl.BlockSpec(memory_space=pltpu.MemorySpace.VMEM),   # xn      (B, 3)
            pl.BlockSpec(memory_space=pltpu.MemorySpace.VMEM),   # wk      (30, 768)
            pl.BlockSpec(memory_space=pltpu.MemorySpace.VMEM),   # wn      (3, 768)
            pl.BlockSpec(memory_space=pltpu.MemorySpace.VMEM),   # bias    (1, 768)
        ],
        out_specs=(
            pl.BlockSpec(memory_space=pltpu.MemorySpace.VMEM),   # attn  (B, 64)
            pl.BlockSpec(memory_space=pltpu.MemorySpace.VMEM),   # graph (B, 640) lane-dense
        ),
        out_shape=(
            jax.ShapeDtypeStruct((nb, FM), jnp.float32),
            jax.ShapeDtypeStruct((nb, C), jnp.float32),
        ),
    )(x_flat, xn.astype(jnp.float32), wk, wn, bias)

    # NOTE: to scale to many point sets, stack them on a leading axis and tile it with a
    # grid axis marked "parallel" (engages v7x's 2nd TensorCore); size per-step blocks
    # large (lane-dense dims >= 512) and budget against 64 MiB VMEM on v7x (32 MiB scoped)
    # vs 128 MiB on v5e/v6e, raising vmem_limit_bytes if needed. Not needed at B=2.
    return attn, graph_flat.reshape(nb, KNN, FM)


# pure-JAX reference mirroring the PyTorch module (correctness gate)
def ref_forward(xknn, xn, wF, bF, w1, b1):
    nb = xknn.shape[0]
    hF_knn = jnp.einsum('fd,bdk->bfk', wF, xknn) + bF[None, :, None]     # (B, F, K)
    s_knn = jnp.einsum('of,bfk->bok', w1, hF_knn) + b1[None, :, None]    # (B, 1, K)
    hF_x = xn @ wF.T + bF                                                # (B, F)
    s_x = hF_x @ w1.T + b1                                               # (B, 1)
    pre = s_knn + s_x[:, :, None]                                        # (B, 1, K)
    xc = jax.nn.softmax(pre, axis=0)                                     # torch 3-D default dim=0
    x2g = hF_knn.reshape(nb, KNN, F)                                     # raw reshape, like torch
    attn = jnp.matmul(xc, x2g)[:, 0, :]                                  # (B, F)
    return jnp.repeat(attn, M, axis=-1), jnp.repeat(x2g, M, axis=-1)


if __name__ == "__main__":
    key = jax.random.PRNGKey(0)
    kp, kx, kn = jax.random.split(key, 3)
    params = init_params(kp)
    prepared = prepare_gap_params(params)      # one-time weight prep (hoisted out of forward)

    xknn = jax.random.normal(kx, (B, DIM, KNN), jnp.float32)   # (B, dim, KNN_size)
    xn = jax.random.normal(kn, (B, DIM), jnp.float32)          # (B, dim)

    fwd = jax.jit(gap_forward)
    head_attn, head_graph = jax.block_until_ready(fwd(xknn, xn, prepared))

    assert head_attn.shape == (B, M * F), head_attn.shape
    assert head_graph.shape == (B, KNN, F * M), head_graph.shape

    ra, rg = ref_forward(xknn, xn, *params)
    err_a = float(jnp.max(jnp.abs(head_attn - ra)))
    err_g = float(jnp.max(jnp.abs(head_graph - rg)))
    assert jnp.allclose(head_attn, ra, rtol=2e-3, atol=2e-3), err_a
    assert jnp.allclose(head_graph, rg, rtol=2e-3, atol=2e-3), err_g

    print("KERNEL_OK")
</pallas_src>

<mosaic_0001>
module attributes {stable_mosaic.version = 11 : i64} {
  func.func @_gap_fused_kernel(%arg0: memref<2x30xf32, #tpu.memory_space<vmem>>, %arg1: memref<2x3xf32, #tpu.memory_space<vmem>>, %arg2: memref<30x768xf32, #tpu.memory_space<vmem>>, %arg3: memref<3x768xf32, #tpu.memory_space<vmem>>, %arg4: memref<1x768xf32, #tpu.memory_space<vmem>>, %arg5: memref<2x64xf32, #tpu.memory_space<vmem>>, %arg6: memref<2x640xf32, #tpu.memory_space<vmem>>) attributes {dimension_semantics = [], scalar_prefetch = 0 : i64, scratch_operands = 0 : i64, tpu.core_type = #tpu.core_type<tc>} {
    %c0 = arith.constant 0 : index
    %c0_0 = arith.constant 0 : index
    %0 = vector.load %arg0[%c0, %c0_0] : memref<2x30xf32, #tpu.memory_space<vmem>>, vector<2x30xf32>
    %c0_1 = arith.constant 0 : index
    %c0_2 = arith.constant 0 : index
    %1 = vector.load %arg2[%c0_1, %c0_2] : memref<30x768xf32, #tpu.memory_space<vmem>>, vector<30x768xf32>
    %cst = arith.constant dense<0.000000e+00> : vector<2x768xf32>
    %2 = tpu.matmul %0, %1, %cst {dimension_numbers = #tpu.dot_dimension_numbers<[1], [0], [0], [1], [0, 0, 1, 1], [], []>, precision = #tpu.contract_precision<fp32>} : vector<2x30xf32>, vector<30x768xf32>, vector<2x768xf32> -> vector<2x768xf32>
    %c0_3 = arith.constant 0 : index
    %c0_4 = arith.constant 0 : index
    %3 = vector.load %arg1[%c0_3, %c0_4] : memref<2x3xf32, #tpu.memory_space<vmem>>, vector<2x3xf32>
    %c0_5 = arith.constant 0 : index
    %c0_6 = arith.constant 0 : index
    %4 = vector.load %arg3[%c0_5, %c0_6] : memref<3x768xf32, #tpu.memory_space<vmem>>, vector<3x768xf32>
    %cst_7 = arith.constant dense<0.000000e+00> : vector<2x768xf32>
    %5 = tpu.matmul %3, %4, %cst_7 {dimension_numbers = #tpu.dot_dimension_numbers<[1], [0], [0], [1], [0, 0, 1, 1], [], []>, precision = #tpu.contract_precision<fp32>} : vector<2x3xf32>, vector<3x768xf32>, vector<2x768xf32> -> vector<2x768xf32>
    %6 = arith.addf %2, %5 : vector<2x768xf32>
    %c0_8 = arith.constant 0 : index
    %c0_9 = arith.constant 0 : index
    %7 = vector.load %arg4[%c0_8, %c0_9] : memref<1x768xf32, #tpu.memory_space<vmem>>, vector<1x768xf32>
    %8 = vector.broadcast %7 : vector<1x768xf32> to vector<2x768xf32>
    %9 = arith.addf %6, %8 : vector<2x768xf32>
    %10 = vector.extract_strided_slice %9 {offsets = [0, 0], sizes = [2, 640], strides = [1, 1]} : vector<2x768xf32> to vector<2x640xf32>
    %c0_10 = arith.constant 0 : index
    %c0_11 = arith.constant 0 : index
    %11 = vector.load %arg6[%c0_10, %c0_11] : memref<2x640xf32, #tpu.memory_space<vmem>>, vector<2x640xf32>
    tpu.vector_store %arg6[%c0_10, %c0_11], %10 {strides = array<i32>} : memref<2x640xf32, #tpu.memory_space<vmem>>, vector<2x640xf32>,
    %12 = vector.extract_strided_slice %9 {offsets = [0, 640], sizes = [2, 10], strides = [1, 1]} : vector<2x768xf32> to vector<2x10xf32>
    %cst_12 = arith.constant dense<0xFF800000> : vector<10xf32>
    %13 = vector.multi_reduction <maximumf>, %12, %cst_12 [0] : vector<2x10xf32> to vector<10xf32>
    %14 = vector.shape_cast %13 : vector<10xf32> to vector<1x10xf32>
    %15 = vector.broadcast %14 : vector<1x10xf32> to vector<2x10xf32>
    %16 = arith.subf %12, %15 : vector<2x10xf32>
    %17 = math.exp %16 : vector<2x10xf32>
    %cst_13 = arith.constant dense<0.000000e+00> : vector<10xf32>
    %18 = vector.multi_reduction <add>, %17, %cst_13 [0] : vector<2x10xf32> to vector<10xf32>
    %19 = vector.shape_cast %18 : vector<10xf32> to vector<1x10xf32>
    %20 = vector.broadcast %19 : vector<1x10xf32> to vector<2x10xf32>
    %21 = arith.divf %17, %20 : vector<2x10xf32>
    %22 = vector.extract_strided_slice %21 {offsets = [0, 0], sizes = [2, 1], strides = [1, 1]} : vector<2x10xf32> to vector<2x1xf32>
    %23 = vector.extract_strided_slice %10 {offsets = [0, 0], sizes = [2, 64], strides = [1, 1]} : vector<2x640xf32> to vector<2x64xf32>
    %24 = vector.broadcast %22 : vector<2x1xf32> to vector<2x64xf32>
    %25 = arith.mulf %24, %23 : vector<2x64xf32>
    %26 = vector.extract_strided_slice %21 {offsets = [0, 1], sizes = [2, 1], strides = [1, 1]} : vector<2x10xf32> to vector<2x1xf32>
    %27 = vector.extract_strided_slice %10 {offsets = [0, 64], sizes = [2, 64], strides = [1, 1]} : vector<2x640xf32> to vector<2x64xf32>
    %28 = vector.broadcast %26 : vector<2x1xf32> to vector<2x64xf32>
    %29 = arith.mulf %28, %27 : vector<2x64xf32>
    %30 = arith.addf %25, %29 : vector<2x64xf32>
    %31 = vector.extract_strided_slice %21 {offsets = [0, 2], sizes = [2, 1], strides = [1, 1]} : vector<2x10xf32> to vector<2x1xf32>
    %32 = vector.extract_strided_slice %10 {offsets = [0, 128], sizes = [2, 64], strides = [1, 1]} : vector<2x640xf32> to vector<2x64xf32>
    %33 = vector.broadcast %31 : vector<2x1xf32> to vector<2x64xf32>
    %34 = arith.mulf %33, %32 : vector<2x64xf32>
    %35 = arith.addf %30, %34 : vector<2x64xf32>
    %36 = vector.extract_strided_slice %21 {offsets = [0, 3], sizes = [2, 1], strides = [1, 1]} : vector<2x10xf32> to vector<2x1xf32>
    %37 = vector.extract_strided_slice %10 {offsets = [0, 192], sizes = [2, 64], strides = [1, 1]} : vector<2x640xf32> to vector<2x64xf32>
    %38 = vector.broadcast %36 : vector<2x1xf32> to vector<2x64xf32>
    %39 = arith.mulf %38, %37 : vector<2x64xf32>
    %40 = arith.addf %35, %39 : vector<2x64xf32>
    %41 = vector.extract_strided_slice %21 {offsets = [0, 4], sizes = [2, 1], strides = [1, 1]} : vector<2x10xf32> to vector<2x1xf32>
    %42 = vector.extract_strided_slice %10 {offsets = [0, 256], sizes = [2, 64], strides = [1, 1]} : vector<2x640xf32> to vector<2x64xf32>
    %43 = vector.broadcast %41 : vector<2x1xf32> to vector<2x64xf32>
    %44 = arith.mulf %43, %42 : vector<2x64xf32>
    %45 = arith.addf %40, %44 : vector<2x64xf32>
    %46 = vector.extract_strided_slice %21 {offsets = [0, 5], sizes = [2, 1], strides = [1, 1]} : vector<2x10xf32> to vector<2x1xf32>
    %47 = vector.extract_strided_slice %10 {offsets = [0, 320], sizes = [2, 64], strides = [1, 1]} : vector<2x640xf32> to vector<2x64xf32>
    %48 = vector.broadcast %46 : vector<2x1xf32> to vector<2x64xf32>
    %49 = arith.mulf %48, %47 : vector<2x64xf32>
    %50 = arith.addf %45, %49 : vector<2x64xf32>
    %51 = vector.extract_strided_slice %21 {offsets = [0, 6], sizes = [2, 1], strides = [1, 1]} : vector<2x10xf32> to vector<2x1xf32>
    %52 = vector.extract_strided_slice %10 {offsets = [0, 384], sizes = [2, 64], strides = [1, 1]} : vector<2x640xf32> to vector<2x64xf32>
    %53 = vector.broadcast %51 : vector<2x1xf32> to vector<2x64xf32>
    %54 = arith.mulf %53, %52 : vector<2x64xf32>
    %55 = arith.addf %50, %54 : vector<2x64xf32>
    %56 = vector.extract_strided_slice %21 {offsets = [0, 7], sizes = [2, 1], strides = [1, 1]} : vector<2x10xf32> to vector<2x1xf32>
    %57 = vector.extract_strided_slice %10 {offsets = [0, 448], sizes = [2, 64], strides = [1, 1]} : vector<2x640xf32> to vector<2x64xf32>
    %58 = vector.broadcast %56 : vector<2x1xf32> to vector<2x64xf32>
    %59 = arith.mulf %58, %57 : vector<2x64xf32>
    %60 = arith.addf %55, %59 : vector<2x64xf32>
    %61 = vector.extract_strided_slice %21 {offsets = [0, 8], sizes = [2, 1], strides = [1, 1]} : vector<2x10xf32> to vector<2x1xf32>
    %62 = vector.extract_strided_slice %10 {offsets = [0, 512], sizes = [2, 64], strides = [1, 1]} : vector<2x640xf32> to vector<2x64xf32>
    %63 = vector.broadcast %61 : vector<2x1xf32> to vector<2x64xf32>
    %64 = arith.mulf %63, %62 : vector<2x64xf32>
    %65 = arith.addf %60, %64 : vector<2x64xf32>
    %66 = vector.extract_strided_slice %21 {offsets = [0, 9], sizes = [2, 1], strides = [1, 1]} : vector<2x10xf32> to vector<2x1xf32>
    %67 = vector.extract_strided_slice %10 {offsets = [0, 576], sizes = [2, 64], strides = [1, 1]} : vector<2x640xf32> to vector<2x64xf32>
    %68 = vector.broadcast %66 : vector<2x1xf32> to vector<2x64xf32>
    %69 = arith.mulf %68, %67 : vector<2x64xf32>
    %70 = arith.addf %65, %69 : vector<2x64xf32>
    %c0_14 = arith.constant 0 : index
    %c0_15 = arith.constant 0 : index
    %71 = vector.load %arg5[%c0_14, %c0_15] : memref<2x64xf32, #tpu.memory_space<vmem>>, vector<2x64xf32>
    tpu.vector_store %arg5[%c0_14, %c0_15], %70 {strides = array<i32>} : memref<2x64xf32, #tpu.memory_space<vmem>>, vector<2x64xf32>,
    return
  }
}

</mosaic_0001>

<bundles_post_ra>
// kernel: gap_forward.1
= control target key start
LH: loop header
LB: loop body
LE: loop exit
PB: predicated region body
PF: predicated region fallthrough
CT: control target
= control target key end

     0   :  { %12 = vsyncpa [#allocation3], 0  ;;  %s4125_s0 = inlined_call_operand.vmem [shape: f32[2,30], index: 0, kind: input, shape index: {}]   ;;  %s4126_s1 = inlined_call_operand.hbm [shape: f32[2,3], index: 1, kind: input, shape index: {}]   ;;  %s4127_s2 = inlined_call_operand.hbm [shape: f32[30,768], index: 2, kind: input, shape index: {}]   ;;  %s4128_s3 = inlined_call_operand.vmem [shape: f32[3,768], index: 3, kind: input, shape index: {}]   ;;  %s4129_s4 = inlined_call_operand.vmem [shape: f32[1,768], index: 4, kind: input, shape index: {}]   ;;  %s4130_s5 = inlined_call_operand.hbm [shape: f32[2,64], index: 5, kind: output, shape index: {0}]   ;;  %s4131_s6 = inlined_call_operand.vmem [shape: f32[2,640], index: 6, kind: output, shape index: {1}]  }
   0x1   :  { %13 = vsyncpa [#allocation6], 0 }
   0x2   :  { %14 = vsyncpa [#allocation4], 0  ;;  %s3444_s21 = smov [#allocation2]   ;;  %s3445_s23 = smov [#allocation5]  }
   0x3   :  { %s23_s22 = sshll.u32 %s3444_s21, 4  ;;  %s32_s24 = sshll.u32 %s3445_s23, 4  ;;  %s24_s22 = int_to_ptr.vmem [resolvable:$true] %s23_s22  ;;  %s33_s24 = int_to_ptr.vmem [resolvable:$true] %s32_s24 }
   0x4   :  { %s3386_s25 = scalar_lea.vmem %s24_s22, 32  ;;  %p3391_p1 = scmp.lt.s32.totalorder %s24_s22, %s24_s22 }
   0x5   :  { %p3387_p0 = scmp.ne.s32.totalorder %s24_s22, %s3386_s25  ;;  %p3392_p2 = scmp.lt.s32.totalorder %s3386_s25, %s3386_s25 }
   0x7   :  { %p3393_p3 = por %p3392_p2, %p3391_p1 }
   0x9   :  { %p3394_p4 = pnand %p3393_p3, %p3387_p0 }
   0xb   :  { %3397 = shalt.err (!%p3394_p4)
}
   0xc   :  { %26 = dma.hbm_to_vmem [thread:$0]  %s4126_s1, 32, %s24_s22, [#allocation3]  }
   0xd   :  { %s3406_s28 = scalar_lea.vmem %s33_s24, 3072  ;;  %p3411_p6 = scmp.lt.s32.totalorder %s33_s24, %s33_s24 }
   0xe   :  { %p3407_p5 = scmp.ne.s32.totalorder %s33_s24, %s3406_s28  ;;  %p3412_p7 = scmp.lt.s32.totalorder %s3406_s28, %s3406_s28 }
  0x10   :  { %p3413_p8 = por %p3412_p7, %p3411_p6 }
  0x12   :  { %p3414_p9 = pnand %p3413_p8, %p3407_p5 }
  0x14   :  { %3417 = shalt.err (!%p3414_p9)
}
  0x15   :  { %s3446_s29 = smov 768   ;;  %s3447_s30 = smov 48  }
  0x16   :  { %38 = dma.hbm_to_vmem [thread:$0]  %s4127_s2, 3072, %s33_s24, [#allocation6], %s3446_s29, %s3446_s29, %s3447_s30  }
  0x17   :  { %3438 = dma.done.wait [#allocation3], 32  }
  0x18   :  { %3439 = vsyncadd [#allocation3], 4294967264 }
  0x19   :  { %3440 = dma.done.wait [#allocation6], 3072  }
  0x1a   :  { %3441 = vsyncadd [#allocation6], 4294964224  ;;  %v3448_v0 = vmov 0.0   ;;  %vm88_vm0 = vcmask 1042432   ;;  %vm84_vm1 = vcmask 23552   ;;  %vm1500_vm2 = vcmask 1045504  }
  0x1b   :  { %167 = vmatprep.mubr.f32.mxu0 %v3448_v0  ;;  %253 = vmatprep.mubr.f32.mxu1 %v3448_v0  ;;  %v75_v1 = vld [vmem:[%s4128_s3] sm:$0x77]  ;;  %v76_v3 = vld [vmem:[%s4128_s3 + $0x8] sm:$0x77]  ;;  %v77_v18 = vld [vmem:[%s4128_s3 + $0x10] sm:$0x77] }
  0x1c   :  { %v74_v2 = vld [vmem:[#allocation2] sm:$0x3]  ;;  %v81_v4 = vcombine.high %v75_v1, %v75_v1  ;;  %v89_v5 = vsel %vm88_vm0, %v75_v1, 0  ;;  %v82_v7 = vcombine.high %v76_v3, %v76_v3  ;;  %v93_v10 = vsel %vm88_vm0, %v76_v3, 0  ;;  %v69_v44 = vld [vmem:[#allocation5 + $0x98] sm:$0x3f] }
  0x1d   :  { %v86_v6 = vsel %vm84_vm1, %v74_v2, 0  ;;  %v133_v8 = vand.u32 4294901760, %v89_v5  ;;  %v3522_v17 = vand.u32 4294901760, %v93_v10  ;;  %v83_v26 = vcombine.high %v77_v18, %v77_v18  ;;  %v68_v46 = vld [vmem:[#allocation5 + $0x90] sm:$0x3f]  ;;  %v63_v53 = vld [vmem:[#allocation5 + $0x68] sm:$0xff] }
  0x1e   :  { %v3512_v9 = vand.u32 4294901760, %v86_v6  ;;  %v91_v11 = vsel %vm88_vm0, %v81_v4, 0  ;;  %v95_v12 = vsel %vm88_vm0, %v82_v7, 0  ;;  %v97_v35 = vsel %vm88_vm0, %v77_v18, 0  ;;  %v49_v51 = vld [vmem:[%s4125_s0] sm:$0x3] }
  0x1f   :  { %v131_v13 = vand.u32 4294901760, %v91_v11  ;;  %v216_v15 = vsub.f32 %v89_v5, %v133_v8  ;;  %v3520_v16 = vand.u32 4294901760, %v95_v12  ;;  %v3536_v27 = vsub.f32 %v93_v10, %v3522_v17  ;;  %v62_v55 = vld [vmem:[#allocation5 + $0x60] sm:$0xff]  ;;  %v57_v57 = vld [vmem:[#allocation5 + $0x38] sm:$0xff]  ;;  %v56_v61 = vld [vmem:[#allocation5 + $0x30] sm:$0xff]  ;;  %s3461_s18 = smov [#allocation7]  }
  0x20   :  { %v3518_v14 = vsub.f32 %v86_v6, %v3512_v9  ;;  %v99_v33 = vsel %vm88_vm0, %v83_v26, 0  ;;  %v3553_v39 = vand.u32 4294901760, %v97_v35  ;;  %v1505_v48 = vsel %vm1500_vm2, %v69_v44, 0  ;;  %v51_v1 = vld [vmem:[#allocation5 + $0x8] sm:$0xff]  ;;  %v50_v4 = vld [vmem:[#allocation5] sm:$0xff]  ;;  %s3327_s19 = sshll.u32 %s3461_s18, 4  ;;  %s3328_s19 = int_to_ptr.vmem [resolvable:$true] %s3327_s19 }
  0x21   :  { %132 = vmatprep.subr.mxu0 %v131_v13  ;;  %v210_v20 = vsub.f32 %v91_v11, %v131_v13  ;;  %v217_v21 = vand.u32 4294901760, %v216_v15  ;;  %v3531_v22 = vsub.f32 %v95_v12, %v3520_v16  ;;  %v682_v34 = vand.u32 4294901760, %v3536_v27  ;;  %s3418_s20 = scalar_lea.vmem %s3328_s19, 32  ;;  %p3423_p11 = scmp.lt.s32.totalorder %s3328_s19, %s3328_s19 }
  0x22   :  { %v3528_v19 = vand.u32 4294901760, %v3518_v14  ;;  %134 = vmatpush1.msra.mxu0 %v133_v8  ;;  %v3547_v37 = vand.u32 4294901760, %v99_v33  ;;  %v3563_v43 = vsub.f32 %v97_v35, %v3553_v39  ;;  %v1502_v50 = vsel %vm1500_vm2, %v68_v46, 0  ;;  %p3419_p10 = scmp.ne.s32.totalorder %s3328_s19, %s3418_s20  ;;  %p3424_p12 = scmp.lt.s32.totalorder %s3418_s20, %s3418_s20 }
  0x23   :  { %v211_v24 = vand.u32 4294901760, %v210_v20  ;;  %293 = vmatprep.subr.mxu0 %v210_v20  ;;  %v218_v25 = vsub.f32 %v216_v15, %v217_v21  ;;  %v676_v31 = vand.u32 4294901760, %v3531_v22  ;;  %v683_v38 = vsub.f32 %v3536_v27, %v682_v34 }
  0x24   :  { %v171_v23 = vsub.f32 %v3518_v14, %v3528_v19  ;;  %v3557_v41 = vsub.f32 %v99_v33, %v3547_v37  ;;  %v1147_v47 = vand.u32 4294901760, %v3563_v43  ;;  %vm1496_vm3 = vcmask 244736   ;;  %p3425_p13 = por %p3424_p12, %p3423_p11 }
  0x25   :  { %v212_v29 = vsub.f32 %v210_v20, %v211_v24  ;;  %v219_v30 = vand.u32 4294901760, %v218_v25  ;;  %v677_v36 = vsub.f32 %v3531_v22, %v676_v31  ;;  %v684_v42 = vand.u32 4294901760, %v683_v38 }
  0x26   :  { %v3538_v28 = vand.u32 4294901760, %v171_v23  ;;  %v1141_v45 = vand.u32 4294901760, %v3557_v41  ;;  %v3587_v52 = vand.u32 4294901760, %v1505_v48  ;;  %v1148_v54 = vsub.f32 %v3563_v43, %v1147_v47  ;;  %p3426_p0 = pnand %p3425_p13, %p3419_p10 }
  0x27   :  { %v213_v32 = vand.u32 4294901760, %v212_v29  ;;  %v678_v40 = vand.u32 4294901760, %v677_v36  ;;  %v3594_v56 = vand.u32 4294901760, %v1502_v50  ;;  %v1498_v58 = vsel %vm1496_vm3, %v49_v51, 0 }
  0x28   :  { %173 = vmatmul.mubr.f32.vlgmr.msra.gmra.mxu0 %v3538_v28  ;;  %v1142_v49 = vsub.f32 %v3557_v41, %v1141_v45  ;;  %v3598_v60 = vand.u32 4294901760, %v63_v53  ;;  %v3602_v62 = vand.u32 4294901760, %v62_v55  ;;  %v3605_v63 = vsub.f32 %v1505_v48, %v3587_v52  ;;  %v65_v48 = vld [vmem:[#allocation5 + $0x78] sm:$0xff] }
  0x29   :  { %296 = vmatpush1.msra.mxu0 %v216_v15  ;;  %329 = vmatprep.mubr.f32.mxu0 %v3448_v0  ;;  %v1149_v2 = vand.u32 4294901760, %v1148_v54  ;;  %v3609_v3 = vand.u32 4294901760, %v57_v57  ;;  %v3611_v5 = vand.u32 4294901760, %v1498_v58  ;;  %v3616_v6 = vsub.f32 %v1502_v50, %v3594_v56  ;;  %v64_v50 = vld [vmem:[#allocation5 + $0x70] sm:$0xff] }
  0x2a   :  { %214 = vmatprep.subr.mxu1 %v213_v32  ;;  %447 = vmatprep.subr.mxu0 %v211_v24  ;;  %v1143_v59 = vand.u32 4294901760, %v1142_v49  ;;  %v3618_v7 = vand.u32 4294901760, %v56_v61  ;;  %v3624_v10 = vsub.f32 %v63_v53, %v3598_v60  ;;  %v3629_v11 = vsub.f32 %v62_v55, %v3602_v62  ;;  %v59_v53 = vld [vmem:[#allocation5 + $0x48] sm:$0xff]  ;;  %v58_v55 = vld [vmem:[#allocation5 + $0x40] sm:$0xff] }
  0x2b   :  { %220 = vmatpush1.msra.mxu1 %v219_v30  ;;  %v1629_v12 = vand.u32 4294901760, %v3605_v63  ;;  %v3636_v15 = vsub.f32 %v1498_v58, %v3611_v5  ;;  %v1635_v18 = vand.u32 4294901760, %v3616_v6  ;;  %v3736_v54 = vand.u32 4294901760, %v65_v48  ;;  %v53_v58 = vld [vmem:[#allocation5 + $0x18] sm:$0xff] }
  0x2c   :  { %255 = vmatmul.mubr.f32.vlgmr.msra.gmra.mxu1 %v3512_v9  ;;  %332 = vmatmul.mubr.f32.vlgmr.msra.gmra.mxu0 %v3518_v14  ;;  %v1641_v20 = vand.u32 4294901760, %v3624_v10  ;;  %v1647_v24 = vand.u32 4294901760, %v3629_v11  ;;  %vm3219_vm4 = vcmask 74752   ;;  %vm3319_vm5 = vcmask 517120  }
  0x2d   :  { %369 = vmatprep.subr.mxu1 %v131_v13  ;;  %404 = vmatprep.mubr.f32.mxu1 %v3448_v0  ;;  %v3666_v25 = vand.u32 4294901760, %v3636_v15 }
  0x2e   :  { %371 = vmatpush1.msra.mxu1 %v133_v8  ;;  %451 = vmatpush1.msra.mxu0 %v217_v21 }
  0x2f   :  { %484 = vmatprep.mubr.f32.mxu0 %v3448_v0  ;;  %523 = vmatprep.subr.mxu1 %v131_v13  ;;  %v3632_v13 = vand.u32 4294901760, %v50_v4  ;;  %v1595_v33 = vsub.f32 %v3636_v15, %v3666_v25 }
  0x30   :  { %408 = vmatmul.mubr.f32.vlgmr.msra.gmra.mxu1 %v3528_v19  ;;  %486 = vmatmul.mubr.f32.vlgmr.msra.gmra.mxu0 %v3512_v9 }
  0x31   :  { %525 = vmatpush1.msra.mxu1 %v133_v8  ;;  %597 = vmatprep.subr.mxu0 %v3520_v16  ;;  %v3621_v8 = vand.u32 4294901760, %v51_v1  ;;  %v3659_v23 = vsub.f32 %v50_v4, %v3632_v13  ;;  %v3755_v4 = vand.u32 4294901760, %v58_v55 }
  0x32   :  { %558 = vmatprep.mubr.f32.mxu1 %v3448_v0  ;;  %599 = vmatpush1.msra.mxu0 %v3522_v17 }
  0x33   :  { %632 = vmatprep.mubr.f32.mxu0 %v3448_v0  ;;  %679 = vmatprep.subr.mxu1 %v678_v40  ;;  %v3651_v21 = vsub.f32 %v51_v1, %v3621_v8  ;;  %v1671_v32 = vand.u32 4294901760, %v3659_v23  ;;  %v3711_v40 = vand.u32 4294901760, %v1595_v33  ;;  %v52_v1 = vld [vmem:[#allocation5 + $0x10] sm:$0xff] }
  0x34   :  { %560 = vmatmul.mubr.f32.vlgmr.msra.gmra.mxu1 %v3512_v9  ;;  %638 = vmatmul.mubr.f32.vlgmr.msra.gmra.mxu0 %v3538_v28 }
  0x35   :  { %685 = vmatpush1.msra.mxu1 %v684_v42  ;;  %758 = vmatprep.subr.mxu0 %v3531_v22  ;;  %v1630_v22 = vsub.f32 %v3605_v63, %v1629_v12  ;;  %v1665_v29 = vand.u32 4294901760, %v3651_v21 }
  0x36   :  { %718 = vmatprep.mubr.f32.mxu1 %v3448_v0  ;;  %761 = vmatpush1.msra.mxu0 %v3536_v27 }
  0x37   :  { %794 = vmatprep.mubr.f32.mxu0 %v3448_v0  ;;  %834 = vmatprep.subr.mxu1 %v3520_v16  ;;  %v1631_v30 = vand.u32 4294901760, %v1630_v22  ;;  %v3760_v22 = vand.u32 4294901760, %v53_v58 }
  0x38   :  { %720 = vmatmul.mubr.f32.vlgmr.msra.gmra.mxu1 %v3512_v9  ;;  %797 = vmatmul.mubr.f32.vlgmr.msra.gmra.mxu0 %v3518_v14 }
  0x39   :  { %836 = vmatpush1.msra.mxu1 %v3522_v17  ;;  %912 = vmatprep.subr.mxu0 %v676_v31  ;;  %v1648_v31 = vsub.f32 %v3629_v11, %v1647_v24 }
  0x3a   :  { %869 = vmatprep.mubr.f32.mxu1 %v3448_v0  ;;  %916 = vmatpush1.msra.mxu0 %v682_v34 }
  0x3b   :  { %949 = vmatprep.mubr.f32.mxu0 %v3448_v0  ;;  %988 = vmatprep.subr.mxu1 %v3520_v16  ;;  %v3639_v16 = vsub.f32 %v57_v57, %v3609_v3  ;;  %v1649_v38 = vand.u32 4294901760, %v1648_v31  ;;  %v3740_v57 = vand.u32 4294901760, %v64_v50 }
  0x3c   :  { %873 = vmatmul.mubr.f32.vlgmr.msra.gmra.mxu1 %v3528_v19  ;;  %951 = vmatmul.mubr.f32.vlgmr.msra.gmra.mxu0 %v3512_v9 }
  0x3d   :  { %990 = vmatpush1.msra.mxu1 %v3522_v17  ;;  %1062 = vmatprep.subr.mxu0 %v3547_v37  ;;  %v3644_v17 = vsub.f32 %v56_v61, %v3618_v7  ;;  %v1653_v26 = vand.u32 4294901760, %v3639_v16 }
  0x3e   :  { %1023 = vmatprep.mubr.f32.mxu1 %v3448_v0  ;;  %1064 = vmatpush1.msra.mxu0 %v3553_v39 }
  0x3f   :  { %1097 = vmatprep.mubr.f32.mxu0 %v3448_v0  ;;  %1144 = vmatprep.subr.mxu1 %v1143_v59  ;;  %v1659_v27 = vand.u32 4294901760, %v3644_v17  ;;  %v3744_v59 = vand.u32 4294901760, %v59_v53 }
  0x40   :  { %1025 = vmatmul.mubr.f32.vlgmr.msra.gmra.mxu1 %v3512_v9  ;;  %1103 = vmatmul.mubr.f32.vlgmr.msra.gmra.mxu0 %v3538_v28  ;;  %v1642_v28 = vsub.f32 %v3624_v10, %v1641_v20 }
  0x41   :  { %1150 = vmatpush1.msra.mxu1 %v1149_v2  ;;  %1223 = vmatprep.subr.mxu0 %v3557_v41  ;;  %v1660_v35 = vsub.f32 %v3644_v17, %v1659_v27 }
  0x42   :  { %1183 = vmatprep.mubr.f32.mxu1 %v3448_v0  ;;  %1226 = vmatpush1.msra.mxu0 %v3563_v43  ;;  %v1643_v36 = vand.u32 4294901760, %v1642_v28 }
  0x43   :  { %1259 = vmatprep.mubr.f32.mxu0 %v3448_v0  ;;  %1299 = vmatprep.subr.mxu1 %v3547_v37  ;;  %v1661_v42 = vand.u32 4294901760, %v1660_v35  ;;  %v73_v35 = vld [vmem:[#allocation5 + $0xb8] sm:$0x3f] }
  0x44   :  { %1185 = vmatmul.mubr.f32.vlgmr.msra.gmra.mxu1 %v3512_v9  ;;  %1262 = vmatmul.mubr.f32.vlgmr.msra.gmra.mxu0 %v3518_v14  ;;  %v1636_v14 = vsub.f32 %v3616_v6, %v1635_v18 }
  0x45   :  { %1301 = vmatpush1.msra.mxu1 %v3553_v39  ;;  %1377 = vmatprep.subr.mxu0 %v1141_v45  ;;  %v70_v45 = vld [vmem:[#allocation5 + $0xa0] sm:$0x3f] }
  0x46   :  { %1381 = vmatpush1.msra.mxu0 %v1147_v47  ;;  %1334 = vmatprep.mubr.f32.mxu1 %v3448_v0  ;;  %v1637_v34 = vand.u32 4294901760, %v1636_v14  ;;  %v1508_v47 = vsel %vm1500_vm2, %v70_v45, 0  ;;  %v3763_v14 = vsub.f32 %v65_v48, %v3736_v54  ;;  %v60_v45 = vld [vmem:[#allocation5 + $0x50] sm:$0xff] }
  0x47   :  { %1414 = vmatprep.mubr.f32.mxu0 %v3448_v0  ;;  %1544 = vmatprep.subr.mxu0 %v3587_v52  ;;  %v3732_v51 = vand.u32 4294901760, %v1508_v47 }
  0x48   :  { %1338 = vmatmul.mubr.f32.vlgmr.msra.gmra.mxu1 %v3528_v19  ;;  %1416 = vmatmul.mubr.f32.vlgmr.msra.gmra.mxu0 %v3512_v9  ;;  %v1654_v19 = vsub.f32 %v3639_v16, %v1653_v26 }
  0x49   :  { %1453 = vmatprep.subr.mxu1 %v3547_v37  ;;  %1546 = vmatpush1.msra.mxu0 %v3594_v56  ;;  %v1666_v37 = vsub.f32 %v3651_v21, %v1665_v29  ;;  %v3753_v2 = vsub.f32 %v1508_v47, %v3732_v51  ;;  %v55_v47 = vld [vmem:[#allocation5 + $0x28] sm:$0xff] }
  0x4a   :  { %1455 = vmatpush1.msra.mxu1 %v3553_v39  ;;  %1548 = vmatprep.subr.mxu0 %v3598_v60  ;;  %v1672_v39 = vsub.f32 %v3659_v23, %v1671_v32  ;;  %v1655_v41 = vand.u32 4294901760, %v1654_v19 }
  0x4b   :  { %1550 = vmatpush1.msra.mxu0 %v3602_v62  ;;  %1488 = vmatprep.mubr.f32.mxu1 %v3448_v0  ;;  %v1667_v43 = vand.u32 4294901760, %v1666_v37  ;;  %v1517_v37 = vsel %vm1500_vm2, %v73_v35, 0 }
  0x4c   :  { %1552 = vmatprep.subr.mxu0 %v3609_v3  ;;  %1632 = vmatprep.subr.mxu1 %v1631_v30  ;;  %v1673_v44 = vand.u32 4294901760, %v1672_v39  ;;  %v67_v39 = vld [vmem:[#allocation5 + $0x88] sm:$0xff] }
  0x4d   :  { %1490 = vmatmul.mubr.f32.vlgmr.msra.gmra.mxu1 %v3512_v9  ;;  %1554 = vmatpush1.msra.mxu0 %v3618_v7  ;;  %v71_v9 = vld [vmem:[#allocation5 + $0xa8] sm:$0x3f] }
  0x4e   :  { %1638 = vmatpush1.msra.mxu1 %v1637_v34  ;;  %1556 = vmatprep.subr.mxu0 %v3621_v8  ;;  %v1511_v46 = vsel %vm1500_vm2, %v71_v9, 0  ;;  %v3870_v9 = vand.u32 4294901760, %v67_v39 }
  0x4f   :  { %1644 = vmatprep.subr.mxu1 %v1643_v36  ;;  %1558 = vmatpush1.msra.mxu0 %v3632_v13  ;;  %v3728_v49 = vand.u32 4294901760, %v1511_v46  ;;  %v72_v36 = vld [vmem:[#allocation5 + $0xb0] sm:$0x3f] }
  0x50   :  { %1591 = vmatprep.mubr.f32.mxu0 %v3448_v0  ;;  %1650 = vmatpush1.msra.mxu1 %v1649_v38  ;;  %v1514_v38 = vsel %vm1500_vm2, %v72_v36, 0 }
  0x51   :  { %1597 = vmatmul.mubr.f32.vlgmr.msra.gmra.mxu0 %v3711_v40  ;;  %1656 = vmatprep.subr.mxu1 %v1655_v41  ;;  %v3747_v61 = vsub.f32 %v1511_v46, %v3728_v49  ;;  %v3862_v41 = vand.u32 4294901760, %v1517_v37 }
  0x52   :  { %1741 = vmatprep.subr.mxu0 %v3605_v63  ;;  %1662 = vmatpush1.msra.mxu1 %v1661_v42  ;;  %v3769_v63 = vsub.f32 %v64_v50, %v3740_v57  ;;  %v66_v42 = vld [vmem:[#allocation5 + $0x80] sm:$0xff] }
  0x53   :  { %1744 = vmatpush1.msra.mxu0 %v3616_v6  ;;  %1668 = vmatprep.subr.mxu1 %v1667_v43  ;;  %v2172_v6 = vand.u32 4294901760, %v3747_v61  ;;  %v3866_v43 = vand.u32 4294901760, %v1514_v38  ;;  %v3874_v46 = vand.u32 4294901760, %v66_v42  ;;  %v3881_v50 = vsub.f32 %v1517_v37, %v3862_v41 }
  0x54   :  { %1747 = vmatprep.subr.mxu0 %v3624_v10  ;;  %1674 = vmatpush1.msra.mxu1 %v1673_v44  ;;  %v3784_v10 = vsub.f32 %v58_v55, %v3755_v4  ;;  %v61_v44 = vld [vmem:[#allocation5 + $0x58] sm:$0xff] }
  0x55   :  { %1707 = vmatprep.mubr.f32.mxu1 %v3448_v0  ;;  %1750 = vmatpush1.msra.mxu0 %v3629_v11  ;;  %v2184_v11 = vand.u32 4294901760, %v3763_v14  ;;  %v3878_v48 = vand.u32 4294901760, %v61_v44  ;;  %v3887_v55 = vsub.f32 %v1514_v38, %v3866_v43 }
  0x56   :  { %1709 = vmatmul.mubr.f32.vlgmr.msra.gmra.mxu1 %v3611_v5  ;;  %1753 = vmatprep.subr.mxu0 %v3639_v16 }
  0x57   :  { %1829 = vmatprep.subr.mxu1 %v3587_v52  ;;  %1756 = vmatpush1.msra.mxu0 %v3644_v17 }
  0x58   :  { %1831 = vmatpush1.msra.mxu1 %v3594_v56  ;;  %1759 = vmatprep.subr.mxu0 %v3651_v21  ;;  %v2202_v21 = vand.u32 4294901760, %v3784_v10 }
  0x59   :  { %1833 = vmatprep.subr.mxu1 %v3598_v60  ;;  %1762 = vmatpush1.msra.mxu0 %v3659_v23 }
  0x5a   :  { %1795 = vmatprep.mubr.f32.mxu0 %v3448_v0  ;;  %1835 = vmatpush1.msra.mxu1 %v3602_v62 }
  0x5b   :  { %1798 = vmatmul.mubr.f32.vlgmr.msra.gmra.mxu0 %v3636_v15  ;;  %1837 = vmatprep.subr.mxu1 %v3609_v3 }
  0x5c   :  { %1913 = vmatprep.subr.mxu0 %v1629_v12  ;;  %1839 = vmatpush1.msra.mxu1 %v3618_v7  ;;  %v3771_v12 = vand.u32 4294901760, %v52_v1 }
  0x5d   :  { %1917 = vmatpush1.msra.mxu0 %v1635_v18  ;;  %1841 = vmatprep.subr.mxu1 %v3621_v8  ;;  %v3778_v18 = vsub.f32 %v59_v53, %v3744_v59  ;;  %v54_v53 = vld [vmem:[#allocation5 + $0x20] sm:$0xff] }
  0x5e   :  { %1921 = vmatprep.subr.mxu0 %v1641_v20  ;;  %1843 = vmatpush1.msra.mxu1 %v3632_v13  ;;  %v2178_v20 = vand.u32 4294901760, %v3753_v2  ;;  %v3798_v16 = vsub.f32 %v52_v1, %v3771_v12  ;;  %v3894_v1 = vand.u32 4294901760, %v55_v47 }
  0x5f   :  { %1876 = vmatprep.mubr.f32.mxu1 %v3448_v0  ;;  %1925 = vmatpush1.msra.mxu0 %v1647_v24  ;;  %v3792_v24 = vsub.f32 %v53_v58, %v3760_v22  ;;  %v2196_v17 = vand.u32 4294901760, %v3778_v18  ;;  %v3889_v58 = vand.u32 4294901760, %v60_v45 }
  0x60   :  { %1880 = vmatmul.mubr.f32.vlgmr.msra.gmra.mxu1 %v3666_v25  ;;  %1929 = vmatprep.subr.mxu0 %v1653_v26  ;;  %v2190_v26 = vand.u32 4294901760, %v3769_v63 }
  0x61   :  { %2007 = vmatprep.subr.mxu1 %v3587_v52  ;;  %1933 = vmatpush1.msra.mxu0 %v1659_v27  ;;  %v2173_v52 = vsub.f32 %v3747_v61, %v2172_v6  ;;  %v2208_v23 = vand.u32 4294901760, %v3792_v24  ;;  %v2214_v27 = vand.u32 4294901760, %v3798_v16  ;;  %v2197_v28 = vsub.f32 %v3778_v18, %v2196_v17 }
  0x62   :  { %2009 = vmatpush1.msra.mxu1 %v3594_v56  ;;  %1937 = vmatprep.subr.mxu0 %v1665_v29  ;;  %v2179_v56 = vsub.f32 %v3753_v2, %v2178_v20  ;;  %v2203_v29 = vsub.f32 %v3784_v10, %v2202_v21 }
  0x63   :  { %2011 = vmatprep.subr.mxu1 %v3598_v60  ;;  %1941 = vmatpush1.msra.mxu0 %v1671_v32  ;;  %v2185_v60 = vsub.f32 %v3763_v14, %v2184_v11  ;;  %v2198_v32 = vand.u32 4294901760, %v2197_v28 }
  0x64   :  { %1974 = vmatprep.mubr.f32.mxu0 %v3448_v0  ;;  %2013 = vmatpush1.msra.mxu1 %v3602_v62  ;;  %v2191_v62 = vsub.f32 %v3769_v63, %v2190_v26  ;;  %v2204_v33 = vand.u32 4294901760, %v2203_v29 }
  0x65   :  { %1976 = vmatmul.mubr.f32.vlgmr.msra.gmra.mxu0 %v3611_v5  ;;  %2015 = vmatprep.subr.mxu1 %v3609_v3  ;;  %v2174_v3 = vand.u32 4294901760, %v2173_v52  ;;  %v2186_v30 = vand.u32 4294901760, %v2185_v60  ;;  %v3897_v52 = vsub.f32 %v67_v39, %v3870_v9 }
  0x66   :  { %2087 = vmatprep.subr.mxu0 %v3728_v49  ;;  %2017 = vmatpush1.msra.mxu1 %v3618_v7  ;;  %v2180_v7 = vand.u32 4294901760, %v2179_v56  ;;  %v2192_v31 = vand.u32 4294901760, %v2191_v62 }
  0x67   :  { %2089 = vmatpush1.msra.mxu0 %v3732_v51  ;;  %2019 = vmatprep.subr.mxu1 %v3621_v8  ;;  %v2209_v8 = vsub.f32 %v3792_v24, %v2208_v23 }
  0x68   :  { %2091 = vmatprep.subr.mxu0 %v3736_v54  ;;  %2021 = vmatpush1.msra.mxu1 %v3632_v13  ;;  %v2215_v13 = vsub.f32 %v3798_v16, %v2214_v27 }
  0x69   :  { %2054 = vmatprep.mubr.f32.mxu1 %v3448_v0  ;;  %2093 = vmatpush1.msra.mxu0 %v3740_v57  ;;  %v2210_v19 = vand.u32 4294901760, %v2209_v8 }
  0x6a   :  { %2056 = vmatmul.mubr.f32.vlgmr.msra.gmra.mxu1 %v3611_v5  ;;  %2095 = vmatprep.subr.mxu0 %v3744_v59  ;;  %v2216_v34 = vand.u32 4294901760, %v2215_v13 }
  0x6b   :  { %2175 = vmatprep.subr.mxu1 %v2174_v3  ;;  %2097 = vmatpush1.msra.mxu0 %v3755_v4 }
  0x6c   :  { %2181 = vmatpush1.msra.mxu1 %v2180_v7  ;;  %2099 = vmatprep.subr.mxu0 %v3760_v22 }
  0x6d   :  { %2187 = vmatprep.subr.mxu1 %v2186_v30  ;;  %2101 = vmatpush1.msra.mxu0 %v3771_v12 }
  0x6e   :  { %2134 = vmatprep.mubr.f32.mxu0 %v3448_v0  ;;  %2193 = vmatpush1.msra.mxu1 %v2192_v31 }
  0x6f   :  { %2140 = vmatmul.mubr.f32.vlgmr.msra.gmra.mxu0 %v3711_v40  ;;  %2199 = vmatprep.subr.mxu1 %v2198_v32 }
  0x70   :  { %2284 = vmatprep.subr.mxu0 %v3747_v61  ;;  %2205 = vmatpush1.msra.mxu1 %v2204_v33  ;;  %v3903_v61 = vsub.f32 %v66_v42, %v3874_v46 }
  0x71   :  { %2287 = vmatpush1.msra.mxu0 %v3753_v2  ;;  %2211 = vmatprep.subr.mxu1 %v2210_v19  ;;  %v2715_v2 = vand.u32 4294901760, %v3881_v50 }
  0x72   :  { %2290 = vmatprep.subr.mxu0 %v3763_v14  ;;  %2217 = vmatpush1.msra.mxu1 %v2216_v34  ;;  %v3918_v14 = vsub.f32 %v60_v45, %v3889_v58 }
  0x73   :  { %2250 = vmatprep.mubr.f32.mxu1 %v3448_v0  ;;  %2293 = vmatpush1.msra.mxu0 %v3769_v63  ;;  %v2727_v63 = vand.u32 4294901760, %v3897_v52 }
  0x74   :  { %2252 = vmatmul.mubr.f32.vlgmr.msra.gmra.mxu1 %v3611_v5  ;;  %2296 = vmatprep.subr.mxu0 %v3778_v18 }
  0x75   :  { %2372 = vmatprep.subr.mxu1 %v3728_v49  ;;  %2299 = vmatpush1.msra.mxu0 %v3784_v10 }
  0x76   :  { %2374 = vmatpush1.msra.mxu1 %v3732_v51  ;;  %2302 = vmatprep.subr.mxu0 %v3792_v24  ;;  %v2745_v24 = vand.u32 4294901760, %v3918_v14 }
  0x77   :  { %2376 = vmatprep.subr.mxu1 %v3736_v54  ;;  %2305 = vmatpush1.msra.mxu0 %v3798_v16 }
  0x78   :  { %2338 = vmatprep.mubr.f32.mxu0 %v3448_v0  ;;  %2378 = vmatpush1.msra.mxu1 %v3740_v57  ;;  %v2746_v60 = vsub.f32 %v3918_v14, %v2745_v24 }
  0x79   :  { %2341 = vmatmul.mubr.f32.vlgmr.msra.gmra.mxu0 %v3636_v15  ;;  %2380 = vmatprep.subr.mxu1 %v3744_v59 }
  0x7a   :  { %2456 = vmatprep.subr.mxu0 %v2172_v6  ;;  %2382 = vmatpush1.msra.mxu1 %v3755_v4  ;;  %v3905_v6 = vand.u32 4294901760, %v54_v53  ;;  %v2747_v3 = vand.u32 4294901760, %v2746_v60 }
  0x7b   :  { %2460 = vmatpush1.msra.mxu0 %v2178_v20  ;;  %2384 = vmatprep.subr.mxu1 %v3760_v22  ;;  %v3912_v20 = vsub.f32 %v61_v44, %v3878_v48 }
  0x7c   :  { %2464 = vmatprep.subr.mxu0 %v2184_v11  ;;  %2386 = vmatpush1.msra.mxu1 %v3771_v12  ;;  %v2721_v11 = vand.u32 4294901760, %v3887_v55  ;;  %v3932_v18 = vsub.f32 %v54_v53, %v3905_v6 }
  0x7d   :  { %2419 = vmatprep.mubr.f32.mxu1 %v3448_v0  ;;  %2468 = vmatpush1.msra.mxu0 %v2190_v26  ;;  %v3926_v26 = vsub.f32 %v55_v47, %v3894_v1  ;;  %v2739_v10 = vand.u32 4294901760, %v3912_v20 }
  0x7e   :  { %2423 = vmatmul.mubr.f32.vlgmr.msra.gmra.mxu1 %v3666_v25  ;;  %2472 = vmatprep.subr.mxu0 %v2196_v17  ;;  %v2733_v17 = vand.u32 4294901760, %v3903_v61  ;;  %v2757_v56 = vand.u32 4294901760, %v3932_v18 }
  0x7f   :  { %2550 = vmatprep.subr.mxu1 %v3728_v49  ;;  %2476 = vmatpush1.msra.mxu0 %v2202_v21  ;;  %v2716_v49 = vsub.f32 %v3881_v50, %v2715_v2  ;;  %v2751_v16 = vand.u32 4294901760, %v3926_v26  ;;  %v2740_v21 = vsub.f32 %v3912_v20, %v2739_v10 }
  0x80   :  { %2552 = vmatpush1.msra.mxu1 %v3732_v51  ;;  %2480 = vmatprep.subr.mxu0 %v2208_v23  ;;  %v2722_v51 = vsub.f32 %v3887_v55, %v2721_v11 }
  0x81   :  { %2554 = vmatprep.subr.mxu1 %v3736_v54  ;;  %2484 = vmatpush1.msra.mxu0 %v2214_v27  ;;  %v2728_v54 = vsub.f32 %v3897_v52, %v2727_v63  ;;  %v2741_v27 = vand.u32 4294901760, %v2740_v21 }
  0x82   :  { %2517 = vmatprep.mubr.f32.mxu0 %v3448_v0  ;;  %2556 = vmatpush1.msra.mxu1 %v3740_v57  ;;  %v2734_v57 = vsub.f32 %v3903_v61, %v2733_v17 }
  0x83   :  { %2519 = vmatmul.mubr.f32.vlgmr.msra.gmra.mxu0 %v3611_v5  ;;  %2558 = vmatprep.subr.mxu1 %v3744_v59  ;;  %v2717_v59 = vand.u32 4294901760, %v2716_v49  ;;  %v2729_v23 = vand.u32 4294901760, %v2728_v54 }
  0x84   :  { %2630 = vmatprep.subr.mxu0 %v3862_v41  ;;  %2560 = vmatpush1.msra.mxu1 %v3755_v4  ;;  %v2723_v4 = vand.u32 4294901760, %v2722_v51  ;;  %v2735_v62 = vand.u32 4294901760, %v2734_v57 }
  0x85   :  { %2632 = vmatpush1.msra.mxu0 %v3866_v43  ;;  %2562 = vmatprep.subr.mxu1 %v3760_v22  ;;  %v2752_v22 = vsub.f32 %v3926_v26, %v2751_v16 }
  0x86   :  { %2634 = vmatprep.subr.mxu0 %v3870_v9  ;;  %2564 = vmatpush1.msra.mxu1 %v3771_v12  ;;  %v2758_v12 = vsub.f32 %v3932_v18, %v2757_v56 }
  0x87   :  { %2597 = vmatprep.mubr.f32.mxu1 %v3448_v0  ;;  %2636 = vmatpush1.msra.mxu0 %v3874_v46  ;;  %v2753_v28 = vand.u32 4294901760, %v2752_v22 }
  0x88   :  { %2599 = vmatmul.mubr.f32.vlgmr.msra.gmra.mxu1 %v3611_v5  ;;  %2638 = vmatprep.subr.mxu0 %v3878_v48  ;;  %v2759_v7 = vand.u32 4294901760, %v2758_v12 }
  0x89   :  { %2718 = vmatprep.subr.mxu1 %v2717_v59  ;;  %2640 = vmatpush1.msra.mxu0 %v3889_v58 }
  0x8a   :  { %2724 = vmatpush1.msra.mxu1 %v2723_v4  ;;  %2642 = vmatprep.subr.mxu0 %v3894_v1 }
  0x8b   :  { %2730 = vmatprep.subr.mxu1 %v2729_v23  ;;  %2644 = vmatpush1.msra.mxu0 %v3905_v6 }
  0x8c   :  { %2677 = vmatprep.mubr.f32.mxu0 %v3448_v0  ;;  %2736 = vmatpush1.msra.mxu1 %v2735_v62 }
  0x8d   :  { %2683 = vmatmul.mubr.f32.vlgmr.msra.gmra.mxu0 %v3711_v40  ;;  %2742 = vmatprep.subr.mxu1 %v2741_v27 }
  0x8e   :  { %2827 = vmatprep.subr.mxu0 %v3881_v50  ;;  %2748 = vmatpush1.msra.mxu1 %v2747_v3 }
  0x8f   :  { %2830 = vmatpush1.msra.mxu0 %v3887_v55  ;;  %2754 = vmatprep.subr.mxu1 %v2753_v28 }
  0x90   :  { %2833 = vmatprep.subr.mxu0 %v3897_v52  ;;  %2760 = vmatpush1.msra.mxu1 %v2759_v7 }
  0x91   :  { %2793 = vmatprep.mubr.f32.mxu1 %v3448_v0  ;;  %2836 = vmatpush1.msra.mxu0 %v3903_v61 }
  0x92   :  { %2795 = vmatmul.mubr.f32.vlgmr.msra.gmra.mxu1 %v3611_v5  ;;  %2839 = vmatprep.subr.mxu0 %v3912_v20  ;;  %v3449_v20 = vmov 5  }
  0x93   :  { %2915 = vmatprep.subr.mxu1 %v3862_v41  ;;  %2842 = vmatpush1.msra.mxu0 %v3918_v14  ;;  %v3450_v14 = vmov 1  }
  0x94   :  { %2917 = vmatpush1.msra.mxu1 %v3866_v43  ;;  %2845 = vmatprep.subr.mxu0 %v3926_v26 }
  0x95   :  { %2919 = vmatprep.subr.mxu1 %v3870_v9  ;;  %2848 = vmatpush1.msra.mxu0 %v3932_v18 }
  0x96   :  { %2881 = vmatprep.mubr.f32.mxu0 %v3448_v0  ;;  %2921 = vmatpush1.msra.mxu1 %v3874_v46 }
  0x97   :  { %2884 = vmatmul.mubr.f32.vlgmr.msra.gmra.mxu0 %v3636_v15  ;;  %2923 = vmatprep.subr.mxu1 %v3878_v48 }
  0x98   :  { %2999 = vmatprep.subr.mxu0 %v2715_v2  ;;  %2925 = vmatpush1.msra.mxu1 %v3889_v58 }
  0x99   :  { %3003 = vmatpush1.msra.mxu0 %v2721_v11  ;;  %2927 = vmatprep.subr.mxu1 %v3894_v1 }
  0x9a   :  { %3007 = vmatprep.subr.mxu0 %v2727_v63  ;;  %2929 = vmatpush1.msra.mxu1 %v3905_v6 }
  0x9b   :  { %2962 = vmatprep.mubr.f32.mxu1 %v3448_v0  ;;  %3011 = vmatpush1.msra.mxu0 %v2733_v17 }
  0x9c   :  { %2966 = vmatmul.mubr.f32.vlgmr.msra.gmra.mxu1 %v3666_v25  ;;  %3015 = vmatprep.subr.mxu0 %v2739_v10 }
  0x9d   :  { %3093 = vmatprep.subr.mxu1 %v3862_v41  ;;  %3019 = vmatpush1.msra.mxu0 %v2745_v24 }
  0x9e   :  { %3095 = vmatpush1.msra.mxu1 %v3866_v43  ;;  %3023 = vmatprep.subr.mxu0 %v2751_v16 }
  0x9f   :  { %3097 = vmatprep.subr.mxu1 %v3870_v9  ;;  %3027 = vmatpush1.msra.mxu0 %v2757_v56 }
  0xa0   :  { %3060 = vmatprep.mubr.f32.mxu0 %v3448_v0  ;;  %3099 = vmatpush1.msra.mxu1 %v3874_v46 }
  0xa1   :  { %3062 = vmatmul.mubr.f32.vlgmr.msra.gmra.mxu0 %v3611_v5  ;;  %3101 = vmatprep.subr.mxu1 %v3878_v48 }
  0xa2   :  { %3103 = vmatpush1.msra.mxu1 %v3889_v58  ;;  %3140 = vmatprep.mubr.f32.mxu1 %v3448_v0 }
  0xa3   :  { %3105 = vmatprep.subr.mxu1 %v3894_v1  ;;  %3362 = vset.pattern.permute.xlu1 %v3449_v20 }
  0xa4   :  { %3107 = vmatpush1.msra.mxu1 %v3905_v6  ;;  %3360 = vset.pattern.permute.xlu0 %v3450_v14 }
  0xa5   :  { %3142 = vmatmul.mubr.f32.vlgmr.msra.gmra.mxu1 %v3611_v5 }
  0xe8   :  { %v174_v15 = vpop.f32.mrf.mxu0 }
  0xea   :  { %v176_v25 = vpop.f32.mrf.mxu0 }
  0xec   :  { %v256_v40 = vpop.f32.mrf.mxu1  ;;  %v333_v29 = vpop.f32.mrf.mxu0 }
  0xed   :  { %v257_v18 = vadd.f32 %v256_v40, %v174_v15 }
  0xee   :  { %v258_v30 = vpop.f32.mrf.mxu1  ;;  %v335_v8 = vpop.f32.mrf.mxu0 }
  0xef   :  { %v259_v63 = vadd.f32 %v258_v30, %v176_v25  ;;  %v334_v54 = vadd.f32 %v333_v29, %v257_v18  ;;  %v3150_v30 = vlaneseq }
  0xf0   :  { %v409_v31 = vpop.f32.mrf.mxu1  ;;  %v487_v13 = vpop.f32.mrf.mxu0 }
  0xf1   :  { %v336_v10 = vadd.f32 %v335_v8, %v259_v63  ;;  %v410_v60 = vadd.f32 %v409_v31, %v334_v54  ;;  %v3451_v54 = vmov 1983009808  }
  0xf2   :  { %v411_v32 = vpop.f32.mrf.mxu1  ;;  %v489_v33 = vpop.f32.mrf.mxu0 }
  0xf3   :  { %v412_v56 = vadd.f32 %v411_v32, %v336_v10  ;;  %v488_v3 = vadd.f32 %v487_v13, %v410_v60 }
  0xf4   :  { %v561_v19 = vpop.f32.mrf.mxu1  ;;  %v639_v35 = vpop.f32.mrf.mxu0 }
  0xf5   :  { %v490_v62 = vadd.f32 %v489_v33, %v412_v56  ;;  %v562_v8 = vadd.f32 %v561_v19, %v488_v3 }
  0xf6   :  { %v563_v34 = vpop.f32.mrf.mxu1  ;;  %v641_v36 = vpop.f32.mrf.mxu0 }
  0xf7   :  { %v564_v25 = vadd.f32 %v563_v34, %v490_v62 }
  0xf8   :  { %v721_v0 = vpop.f32.mrf.mxu1  ;;  %v798_v38 = vpop.f32.mrf.mxu0 }
  0xf9   :  { %v722_v51 = vadd.f32 %v721_v0, %v639_v35 }
  0xfa   :  { %v723_v37 = vpop.f32.mrf.mxu1  ;;  %v800_v41 = vpop.f32.mrf.mxu0 }
  0xfb   :  { %v724_v16 = vadd.f32 %v723_v37, %v641_v36  ;;  %v799_v59 = vadd.f32 %v798_v38, %v722_v51 }
  0xfc   :  { %v874_v39 = vpop.f32.mrf.mxu1  ;;  %v952_v42 = vpop.f32.mrf.mxu0 }
  0xfd   :  { %v801_v23 = vadd.f32 %v800_v41, %v724_v16  ;;  %v875_v12 = vadd.f32 %v874_v39, %v799_v59  ;;  %v4059_v41 = vshrl.u32 %v3150_v30, 7 }
  0xfe   :  { %v876_v5 = vpop.f32.mrf.mxu1  ;;  %v954_v44 = vpop.f32.mrf.mxu0 }
  0xff   :  { %v877_v28 = vadd.f32 %v876_v5, %v801_v23  ;;  %v953_v40 = vadd.f32 %v952_v42, %v875_v12  ;;  %v3156_v34 = vsub.s32 1, %v4059_v41  ;;  %v3164_v56 = vsub.s32 3, %v4059_v41 }
 0x100   :  { %v1026_v43 = vpop.f32.mrf.mxu1  ;;  %v4035_v45 = vpop.f32.mrf.mxu0 }
 0x101   :  { %v955_v35 = vadd.f32 %v954_v44, %v877_v28  ;;  %v1027_v36 = vadd.f32 %v1026_v43, %v953_v40  ;;  %v3152_v43 = vsub.s32 0, %v4059_v41 }
 0x102   :  { %v1028_v9 = vpop.f32.mrf.mxu1  ;;  %v4039_v47 = vpop.f32.mrf.mxu0 }
 0x103   :  { %v1029_v39 = vadd.f32 %v1028_v9, %v955_v35 }
 0x104   :  { %v4037_v46 = vpop.f32.mrf.mxu1  ;;  %v4043_v50 = vpop.f32.mrf.mxu0 }
 0x106   :  { %v4041_v48 = vpop.f32.mrf.mxu1  ;;  %v4047_v55 = vpop.f32.mrf.mxu0 }
 0x108   :  { %v4045_v53 = vpop.f32.mrf.mxu1  ;;  %v4051_v1 = vpop.f32.mrf.mxu0 }
 0x10a   :  { %v4049_v58 = vpop.f32.mrf.mxu1  ;;  %v4055_v61 = vpop.f32.mrf.mxu0 }
 0x10d   :  { %v4053_v52 = vpop.f32.mrf.mxu1 }
 0x10f   :  { %v4057_v2 = vpop.f32.mrf.mxu1 }
 0x111   :  { %v1598_v6 = vpop.f32.mrf.mxu0 }
 0x112   :  { %v1599_v37 = vadd.f32 %v1598_v6, %v562_v8 }
 0x113   :  { %v1600_v26 = vpop.f32.mrf.mxu0 }
 0x114   :  { %v1601_v32 = vadd.f32 %v1600_v26, %v564_v25 }
 0x116   :  { %v1710_v11 = vpop.f32.mrf.mxu1 }
 0x117   :  { %v1711_v13 = vadd.f32 %v1710_v11, %v1599_v37 }
 0x118   :  { %v1712_v49 = vpop.f32.mrf.mxu1 }
 0x119   :  { %v1713_v31 = vadd.f32 %v1712_v49, %v1601_v32  ;;  %v4066_v49 = vld [vmem:[%s4129_s4] sm:$0x3f]  ;;  %v1189_v32 = vadd.f32 %v4041_v48, %v4039_v47 }
 0x11a   :  { %v3157_v51 = vrot.slane %v4066_v49, %v3156_v34  ;;  %v3153_v12 = vrot.slane %v4066_v49, %v3152_v43  ;;  %v3165_v8 = vrot.slane %v4066_v49, %v3164_v56 }
 0x11b   :  { %v1799_v17 = vpop.f32.mrf.mxu0 }
 0x11c   :  { %v1800_v14 = vadd.f32 %v1799_v17, %v1711_v13  ;;  %v3194_v17 = vunpack.c.l.s4 %v3451_v54 }
 0x11d   :  { %v1801_v57 = vpop.f32.mrf.mxu0 }
 0x11e   :  { %v1802_v5 = vadd.f32 %v1801_v57, %v1713_v31  ;;  %v3160_v57 = vsub.s32 2, %v4059_v41  ;;  %v3195_v28 = vunpack.c.0.s8 %v3194_v17 }
 0x120   :  { %v1881_v24 = vpop.f32.mrf.mxu1  ;;  %v3161_v25 = vrot.slane %v4066_v49, %v3160_v57 }
 0x121   :  { %v1882_v6 = vadd.f32 %v1881_v24, %v1800_v14 }
 0x122   :  { %v1883_v4 = vpop.f32.mrf.mxu1 }
 0x123   :  { %v1884_v63 = vadd.f32 %v1883_v4, %v1802_v5 }
 0x125   :  { %v1977_v21 = vpop.f32.mrf.mxu0 }
 0x126   :  { %v1978_v59 = vadd.f32 %v1977_v21, %v1882_v6  ;;  %v1187_v21 = vadd.f32 %v4037_v46, %v4035_v45  ;;  %v1266_v46 = vadd.f32 %v4047_v55, %v1189_v32 }
 0x127   :  { %v1979_v27 = vpop.f32.mrf.mxu0 }
 0x128   :  { %v1980_v18 = vadd.f32 %v1979_v27, %v1884_v63  ;;  %v1342_v13 = vadd.f32 %v4049_v58, %v1266_v46  ;;  %v3453_v46 = vmov 3  }
 0x12a   :  { %v2057_v22 = vpop.f32.mrf.mxu1  ;;  %v1420_v34 = vadd.f32 %v4055_v61, %v1342_v13  ;;  %v3458_v13 = vmov 6  }
 0x12b   :  { %v2058_v62 = vadd.f32 %v2057_v22, %v1978_v59 }
 0x12c   :  { %v2059_v15 = vpop.f32.mrf.mxu1 }
 0x12d   :  { %v2060_v24 = vadd.f32 %v2059_v15, %v1980_v18  ;;  %v4078_v35 = vadd.f32 %v3153_v12, %v2058_v62 }
 0x12f   :  { %v2141_v7 = vpop.f32.mrf.mxu0  ;;  %v4073_v40 = vadd.f32 %v3157_v51, %v2060_v24  ;;  %v3172_v51 = vsub.s32 5, %v4059_v41 }
 0x130   :  { %v2142_v20 = vadd.f32 %v2141_v7, %v1027_v36  ;;  %v3198_v36 = vsub.s32 %v3195_v28, %v4059_v41 }
 0x131   :  { %v2143_v0 = vpop.f32.mrf.mxu0  ;;  %v3173_v59 = vrot.slane %v4066_v49, %v3172_v51 }
 0x132   :  { %v2144_v19 = vadd.f32 %v2143_v0, %v1029_v39  ;;  %v3191_v0 = vcombine.low %v4078_v35, %v4073_v40 }
 0x134   :  { %v2253_v29 = vpop.f32.mrf.mxu1 }
 0x135   :  { %v2254_v44 = vadd.f32 %v2253_v29, %v2142_v20 }
 0x136   :  { %v2255_v33 = vpop.f32.mrf.mxu1 }
 0x137   :  { %v2256_v9 = vadd.f32 %v2255_v33, %v2144_v19  ;;  %v3199_v33 = vrot.slane %v3191_v0, %v3198_v36 }
 0x139   :  { %v2342_v38 = vpop.f32.mrf.mxu0 }
 0x13a   :  { %v2343_v11 = vadd.f32 %v2342_v38, %v2254_v44  ;;  %v1264_v38 = vadd.f32 %v4043_v50, %v1187_v21 }
 0x13b   :  { %v2344_v26 = vpop.f32.mrf.mxu0 }
 0x13c   :  { %v2345_v4 = vadd.f32 %v2344_v26, %v2256_v9  ;;  %v1340_v47 = vadd.f32 %v4045_v53, %v1264_v38  ;;  %v1494_v53 = vadd.f32 %v4057_v2, %v1420_v34  ;;  %v3168_v9 = vsub.s32 4, %v4059_v41 }
 0x13e   :  { %v2424_v42 = vpop.f32.mrf.mxu1  ;;  %v1418_v20 = vadd.f32 %v4051_v1, %v1340_v47  ;;  %v3169_v2 = vrot.slane %v4066_v49, %v3168_v9  ;;  %v3456_v47 = vmov 2  }
 0x13f   :  { %v2425_v60 = vadd.f32 %v2424_v42, %v2343_v11 }
 0x140   :  { %v2426_v16 = vpop.f32.mrf.mxu1  ;;  %v1492_v55 = vadd.f32 %v4053_v52, %v1418_v20 }
 0x141   :  { %v2427_v27 = vadd.f32 %v2426_v16, %v2345_v4 }
 0x143   :  { %v2520_v10 = vpop.f32.mrf.mxu0 }
 0x144   :  { %v2521_v3 = vadd.f32 %v2520_v10, %v2425_v60 }
 0x145   :  { %v2522_v23 = vpop.f32.mrf.mxu0 }
 0x146   :  { %v2523_v30 = vadd.f32 %v2522_v23, %v2427_v27 }
 0x148   :  { %v2600_v7 = vpop.f32.mrf.mxu1 }
 0x149   :  { %v2601_v29 = vadd.f32 %v2600_v7, %v2521_v3 }
 0x14a   :  { %v2602_v15 = vpop.f32.mrf.mxu1 }
 0x14b   :  { %v2603_v22 = vadd.f32 %v2602_v15, %v2523_v30  ;;  %v4085_v37 = vadd.f32 %v3161_v25, %v2601_v29 }
 0x14d   :  { %v4087_v31 = vadd.f32 %v3165_v8, %v2603_v22  ;;  %v2684_v5 = vpop.f32.mrf.mxu0 }
 0x14e   :  { %v2685_v19 = vadd.f32 %v2684_v5, %v1492_v55  ;;  %v3459_v5 = vmov 8  }
 0x14f   :  { %v3192_v45 = vcombine.low %v4085_v37, %v4087_v31  ;;  %v2686_v42 = vpop.f32.mrf.mxu0 }
 0x150   :  { %v2687_v58 = vadd.f32 %v2686_v42, %v1494_v53 }
 0x151   :  { %v3206_v39 = vrot.slane %v3192_v45, %v3198_v36  ;;  %v3452_v45 = vmov 7  }
 0x152   :  { %v2796_v50 = vpop.f32.mrf.mxu1 }
 0x153   :  { %v3207_v48 = vcombine.low %v3199_v33, %v3206_v39  ;;  %v2797_v26 = vadd.f32 %v2796_v50, %v2685_v19  ;;  %v3454_v33 = vmov 9   ;;  %v3455_v39 = vmov 0  }
 0x154   :  { %v2798_v14 = vpop.f32.mrf.mxu1 }
 0x155   :  { %3217 = vst [vmem:[%s4131_s6] sm:$0xff] %v3207_v48  ;;  %v2799_v6 = vadd.f32 %v2798_v14, %v2687_v58  ;;  %v3457_v48 = vmov 4  }
 0x157   :  { %v2885_v63 = vpop.f32.mrf.mxu0 }
 0x158   :  { %v2886_v18 = vadd.f32 %v2885_v63, %v2797_v26 }
 0x159   :  { %v2887_v43 = vpop.f32.mrf.mxu0 }
 0x15a   :  { %v2888_v10 = vadd.f32 %v2887_v43, %v2799_v6 }
 0x15c   :  { %v2967_v44 = vpop.f32.mrf.mxu1 }
 0x15d   :  { %v2968_v61 = vadd.f32 %v2967_v44, %v2886_v18 }
 0x15e   :  { %v2969_v1 = vpop.f32.mrf.mxu1 }
 0x15f   :  { %v2970_v54 = vadd.f32 %v2969_v1, %v2888_v10 }
 0x161   :  { %v3063_v11 = vpop.f32.mrf.mxu0 }
 0x162   :  { %v3064_v17 = vadd.f32 %v3063_v11, %v2968_v61 }
 0x163   :  { %v3065_v52 = vpop.f32.mrf.mxu0 }
 0x164   :  { %v3066_v57 = vadd.f32 %v3065_v52, %v2970_v54 }
 0x165   :  { %v3143_v16 = vpop.f32.mrf.mxu1 }
 0x166   :  { %v3144_v56 = vadd.f32 %v3143_v16, %v3064_v17 }
 0x167   :  { %v3145_v24 = vpop.f32.mrf.mxu1 }
 0x168   :  { %v4106_v4 = vadd.f32 %v3169_v2, %v3144_v56  ;;  %v3146_v60 = vadd.f32 %v3145_v24, %v3066_v57 }
 0x16a   :  { %3341 = vst.sshfl [vmem:[%s4131_s6 + $0x8] sm:$0x3 pattern:$0x76325410] %v4106_v4  ;;  %v3185_v41 = vadd.f32 %v3173_v59, %v3146_v60  ;;  %s3460_s6 = smov 64  }
 0x16c   :  { %v3220_v23 = vsel %vm3219_vm4, %v3185_v41, -inf }
 0x16d   :  { %v3221_v62 = vrot.slane %v3220_v23, 4 }
 0x16f   :  { %v3222_v12 = vmax.f32 %v3220_v23, %v3221_v62 }
 0x171   :  { %v3223_v27 = vrot.slane %v3222_v12, 2 }
 0x173   :  { %v3224_v3 = vmax.f32 %v3222_v12, %v3223_v27 }
 0x175   :  { %v3225_v28 = vrot.slane %v3224_v3, 1 }
 0x177   :  { %v3226_v7 = vmax.f32 %v3224_v3, %v3225_v28 }
 0x179   :  { %v3227_v25 = vsub.f32 %v3185_v41, %v3226_v7 }
 0x17b   :  { %v3228_v49 = vmul.f32 1.442695, %v3227_v25 }
 0x17d   :  { %3374 = vpow2.f32 %v3228_v49 }
 0x18a   :  { %v3375_v30 = vpop.eup %3374 }
 0x18b   :  { %v3230_v29 = vsel %vm3219_vm4, %v3375_v30, 0.0 }
 0x18c   :  { %v3231_v8 = vrot.slane %v3230_v29, 4 }
 0x18e   :  { %v3232_v21 = vadd.f32 %v3231_v8, %v3230_v29 }
 0x190   :  { %v3233_v15 = vrot.slane %v3232_v21, 2 }
 0x192   :  { %v3234_v22 = vadd.f32 %v3233_v15, %v3232_v21 }
 0x194   :  { %v3235_v32 = vrot.slane %v3234_v22, 1 }
 0x196   :  { %v3236_v0 = vadd.f32 %v3235_v32, %v3234_v22 }
 0x198   :  { %3376 = vrcp.f32 %v3236_v0 }
 0x1a5   :  { %v3377_v36 = vpop.eup %3376 }
 0x1a6   :  { %v3238_v38 = vmul.f32 %v3377_v36, %v3375_v30 }
 0x1a8   :  { %3278 = vperm.xlu1 %3362, %v3238_v38   ;;  %3246 = vperm.xlu0 %3360, %v3238_v38  }
 0x1ac   :  { %3363 = vset.pattern.permute.xlu1 %v3452_v45  ;;  %3361 = vset.pattern.permute.xlu0 %v3453_v46 }
 0x1ad   :  { %3294 = vperm.xlu1 %3363, %v3238_v38   ;;  %3262 = vperm.xlu0 %3361, %v3238_v38  }
 0x1b1   :  { %3364 = vset.pattern.permute.xlu1 %v3454_v33  ;;  %3365 = vset.pattern.permute.xlu0 %v3455_v39 }
 0x1b2   :  { %3310 = vperm.xlu1 %3364, %v3238_v38   ;;  %3241 = vperm.xlu0 %3365, %v3238_v38  }
 0x1b6   :  { %3366 = vset.pattern.permute.xlu1 %v3456_v47  ;;  %3370 = vset.pattern.permute.xlu0 %v3454_v33 }
 0x1b7   :  { %3256 = vperm.xlu1 %3366, %v3238_v38  }
 0x1bb   :  { %3367 = vset.pattern.permute.xlu1 %v3457_v48 }
 0x1bc   :  { %3272 = vperm.xlu1 %3367, %v3238_v38  }
 0x1c0   :  { %3368 = vset.pattern.permute.xlu1 %v3458_v13 }
 0x1c1   :  { %3288 = vperm.xlu1 %3368, %v3238_v38  }
 0x1c5   :  { %3369 = vset.pattern.permute.xlu1 %v3459_v5 }
 0x1c6   :  { %3304 = vperm.xlu1 %3369, %v3238_v38  }
 0x223   :  { %v3279_v20 = vpop.permute.xlu1 %3278  ;;  %v3247_v50 = vpop.permute.xlu0 %3246 }
 0x224   :  { %v3249_v34 = vmul.f32 %v3247_v50, %v4078_v35  ;;  %v3281_v53 = vmul.f32 %v3279_v20, %v4085_v37 }
 0x226   :  { %3251 = vrot.lane.b32.xlu0 %v3249_v34, %s3460_s6 }
 0x228   :  { %v3295_v42 = vpop.permute.xlu1 %3294  ;;  %v3263_v55 = vpop.permute.xlu0 %3262 }
 0x229   :  { %v3297_v14 = vmul.f32 %v3295_v42, %v4087_v31  ;;  %v3265_v63 = vmul.f32 %v3263_v55, %v4073_v40 }
 0x22b   :  { %3299 = vrot.lane.b32.xlu1 %v3297_v14, %s3460_s6  ;;  %3267 = vrot.lane.b32.xlu0 %v3265_v63, %s3460_s6 }
 0x22d   :  { %v3311_v19 = vpop.permute.xlu1 %3310  ;;  %v3242_v26 = vpop.permute.xlu0 %3241 }
 0x22e   :  { %v3313_v44 = vmul.f32 %v3311_v19, %v4106_v4  ;;  %v3244_v6 = vmul.f32 %v3242_v26, %v4078_v35 }
 0x22f   :  { %3283 = vrot.lane.b32.xlu0 %v3281_v53, %s3460_s6 }
 0x232   :  { %v3257_v58 = vpop.permute.xlu1 %3256 }
 0x233   :  { %3315 = vrot.lane.b32.xlu0 %v3313_v44, %s3460_s6  ;;  %v3259_v9 = vmul.f32 %v3257_v58, %v4073_v40 }
 0x237   :  { %v3273_v43 = vpop.permute.xlu1 %3272 }
 0x238   :  { %v3275_v51 = vmul.f32 %v3273_v43, %v4085_v37 }
 0x23c   :  { %v3289_v11 = vpop.permute.xlu1 %3288 }
 0x23d   :  { %v3291_v16 = vmul.f32 %v3289_v11, %v4087_v31 }
 0x241   :  { %v3305_v17 = vpop.permute.xlu1 %3304 }
 0x242   :  { %v3307_v35 = vmul.f32 %v3305_v17, %v4106_v4 }
 0x298   :  { %v3252_v18 = vpop.permute.xlu0 %3251 }
 0x299   :  { %v3254_v1 = vadd.f32 %v3252_v18, %v3244_v6 }
 0x29b   :  { %v3260_v10 = vadd.f32 %v3259_v9, %v3254_v1 }
 0x29d   :  { %v3268_v61 = vpop.permute.xlu0 %3267  ;;  %v3300_v59 = vpop.permute.xlu1 %3299 }
 0x29e   :  { %v3270_v52 = vadd.f32 %v3268_v61, %v3260_v10 }
 0x2a0   :  { %v3276_v54 = vadd.f32 %v3275_v51, %v3270_v52 }
 0x2a1   :  { %v3284_v2 = vpop.permute.xlu0 %3283 }
 0x2a2   :  { %v3286_v57 = vadd.f32 %v3284_v2, %v3276_v54 }
 0x2a4   :  { %v3292_v56 = vadd.f32 %v3291_v16, %v3286_v57 }
 0x2a5   :  { %v3316_v60 = vpop.permute.xlu0 %3315 }
 0x2a6   :  { %v3302_v24 = vadd.f32 %v3300_v59, %v3292_v56 }
 0x2a8   :  { %v3308_v40 = vadd.f32 %v3307_v35, %v3302_v24 }
 0x2aa   :  { %v3318_v41 = vadd.f32 %v3316_v60, %v3308_v40 }
 0x2ac   :  { %3320 = vst.msk [vmem:[#allocation7] sm:$0x3] %vm3319_vm5, %v3318_v41 }
 0x2ad   :  { %3429 = shalt.err (!%p3426_p0)
}
 0x2ae   :  { %3330 = dma.vmem_to_hbm [thread:$0]  %s3328_s19, 32, %s4130_s5, [#allocation4]  }
 0x2af   :  { %3442 = dma.done.wait [#allocation4], 32  }
 0x2b0   :  { %3443 = vsyncadd [#allocation4], 4294967264 }
 0x2b1   :  { %3338 = vsyncpa [#allocation3], 1 }
 0x2b2   :  { %3339 = vsyncpa [#allocation6], 1 }
 0x2b3   :  { %3340 = vsyncpa [#allocation4], 1 }

</bundles_post_ra>
